<compile_context>
chip_gen: v7x
topology: tpu7x:2x2x1
jax: 0.10.0
libtpu: 0.0.40
codegen_flags: <defaults>
</compile_context>

<pallas_src>
import functools

import jax
import jax.numpy as jnp
from jax.experimental import pallas as pl
from jax.experimental.pallas import tpu as pltpu

_MiB = 1024 * 1024


def _round_up(n, m):
    return ((n + m - 1) // m) * m


def _cdiv(a, b):
    return (a + b - 1) // b


@functools.lru_cache(maxsize=1)
def _tpu_generation_info():
    """Returns (vmem_capacity_bytes, tensorcores_per_chip).

    Uses pltpu.get_tpu_info() when available; falls back to conservative
    v7x-like settings (64 MiB VMEM, 2 TensorCores) so the chosen tiling and
    VMEM limit stay valid on every generation even if the query fails.
    """
    vmem_cap = 64 * _MiB
    try:
        vmem_cap = int(pltpu.get_tpu_info().vmem_capacity_bytes)
    except Exception:
        pass
    # v7x: 64 MiB VMEM per TC, 2 TCs/chip.  v5e/v6e: 128 MiB, 1 TC.
    n_cores = 2 if vmem_cap <= 96 * _MiB else 1
    return vmem_cap, n_cores


def _mlp_att_kernel(x_ref, w1_ref, b1_ref, w2_ref, b2_ref, o_ref, h_ref):
    # fc1: cast the x tile to the MXU operand dtype in-kernel (cheap VPU op,
    # hidden under the tile DMA; avoids a separate XLA cast pass over x in
    # HBM).  f32 accumulation on the MXU; bias + ReLU in f32 on the VPU.
    x = x_ref[...].astype(w1_ref.dtype)
    h = jnp.dot(x, w1_ref[...], preferred_element_type=jnp.float32)
    h = jnp.maximum(h + b1_ref[...], 0.0)
    # Activation scratch in the compute dtype (bf16 by default): halves the
    # [block_b, hid_p] VMEM round-trip vs an f32 scratch.
    h_ref[...] = h.astype(h_ref.dtype)

    # fc2
    y = jnp.dot(h_ref[...], w2_ref[...], preferred_element_type=jnp.float32)
    o_ref[...] = jnp.maximum(y + b2_ref[...], 0.0).astype(o_ref.dtype)


def prepare_mlp_att_params(w1, b1, w2, b2, *, compute_dtype=jnp.bfloat16):
    """Pad + cast the weights ONCE (hoisted out of the per-call forward).

    w1: [inp, hid] (= torch fc1.weight.T), b1: [hid],
    w2: [hid, out] (= torch fc2.weight.T), b2: [out].

    Only the N dims (hid, out) are padded to multiples of 128 (lane-dense MXU
    output / unmasked stores); the fc1 reduction dim (inp) is left unpadded --
    the MXU pads K internally, so zero-padding it in HBM would only add bytes.
    Zero padding is mathematically exact (padded columns compute ReLU(0)=0).
    """
    cdt = jnp.dtype(compute_dtype)
    inp_dim, hid_dim = w1.shape
    out_dim = w2.shape[1]
    hid_p = _round_up(hid_dim, 128)
    out_p = _round_up(out_dim, 128)

    w1_p = jnp.zeros((inp_dim, hid_p), cdt).at[:, :hid_dim].set(w1.astype(cdt))
    w2_p = jnp.zeros((hid_p, out_p), cdt).at[:hid_dim, :out_dim].set(w2.astype(cdt))
    b1_p = jnp.zeros((1, hid_p), jnp.float32).at[:, :hid_dim].set(
        jnp.reshape(b1, (1, -1)).astype(jnp.float32))
    b2_p = jnp.zeros((1, out_p), jnp.float32).at[:, :out_dim].set(
        jnp.reshape(b2, (1, -1)).astype(jnp.float32))

    return dict(w1=w1_p, b1=b1_p, w2=w2_p, b2=b2_p,
                inp_dim=inp_dim, hid_dim=hid_dim, out_dim=out_dim,
                compute_dtype=cdt)


def mlp_att_forward(x, params, *, block_b=None, out_dtype=None,
                    unpad_output=True):
    """x: [B, inp_dim], params: from prepare_mlp_att_params.

    Returns [B, out_dim] when unpad_output=True (module semantics), otherwise
    the lane-padded [B, out_p] slab (rows-only slice; no strided column copy).
    Output dtype defaults to the compute dtype (bf16) to halve HBM writes;
    pass out_dtype=jnp.float32 for an f32 output.
    """
    w1_p, b1_p, w2_p, b2_p = params["w1"], params["b1"], params["w2"], params["b2"]
    inp_dim, out_dim = params["inp_dim"], params["out_dim"]
    cdt = params["compute_dtype"]
    hid_p = w1_p.shape[1]
    out_p = w2_p.shape[1]

    B, x_inp = x.shape
    if x_inp != inp_dim:
        raise ValueError(f"x has {x_inp} features, params expect {inp_dim}")

    if out_dtype is None:
        out_dtype = cdt
    out_dtype = jnp.dtype(out_dtype)

    vmem_cap, n_cores = _tpu_generation_info()

    itemsizes = (jnp.dtype(x.dtype).itemsize, cdt.itemsize, out_dtype.itemsize)
    row_align = 8 if min(itemsizes) >= 4 else 16

    # Batch tile: at least one tile per TensorCore (so v7x's second TC is not
    # idle), capped at 512 rows on v7x and 1024 rows on single-TC v5e/v6e.
    cap = 512 if n_cores > 1 else 1024
    if block_b is None:
        block_b = max(row_align,
                      min(cap, _round_up(_cdiv(B, n_cores), row_align)))
    if block_b % row_align != 0:
        raise ValueError(f"block_b={block_b} must be a multiple of {row_align}")

    B_p = _round_up(max(B, block_b), block_b)
    grid = (B_p // block_b,)

    # Per-call wrapper work is only an (optional) batch-row pad of x; weights
    # were padded/cast once at prepare time and x's K dim is left unpadded.
    x_in = x if B_p == B else jnp.zeros((B_p, inp_dim), x.dtype).at[:B].set(x)

    xsz = jnp.dtype(x.dtype).itemsize
    csz = cdt.itemsize
    osz = out_dtype.itemsize

    cost = pl.CostEstimate(
        flops=2 * B_p * (inp_dim * hid_p + hid_p * out_p),
        transcendentals=0,
        bytes_accessed=(B_p * inp_dim * xsz
                        + (inp_dim * hid_p + hid_p * out_p) * csz
                        + (hid_p + out_p) * 4
                        + B_p * out_p * osz),
    )

    # VMEM budget: double-buffered x/out tiles, single-buffered resident
    # weights/biases (pl.Buffered(1): same block every grid step), plus the
    # compute-dtype activation scratch.
    vmem_bytes = (
        2 * block_b * inp_dim * xsz
        + 2 * block_b * out_p * osz
        + (inp_dim * hid_p + hid_p * out_p) * csz
        + (hid_p + out_p) * 4
        + block_b * hid_p * csz
    )
    # Generation-gated limit: headroom under v7x's 64 MiB physical VMEM; allow
    # v5e/v6e's larger 128 MiB VMEM to host bigger weight shapes.
    vmem_ceiling = 48 * _MiB if vmem_cap <= 96 * _MiB else 100 * _MiB
    vmem_limit = min(vmem_ceiling, max(32 * _MiB, int(vmem_bytes * 1.5)))
    # TODO(synk): if inp_dim/hid_dim grow so the single-buffered w1/w2 no longer
    # fit under vmem_ceiling, add a K-reduction grid axis with a pl.when-guarded
    # f32 accumulator instead of keeping the full weights resident.

    resident = pl.Buffered(1)  # constant block index -> no double buffering

    out_padded = pl.pallas_call(
        _mlp_att_kernel,
        out_shape=jax.ShapeDtypeStruct((B_p, out_p), out_dtype),
        grid_spec=pltpu.PrefetchScalarGridSpec(
            num_scalar_prefetch=0,
            grid=grid,
            in_specs=[
                pl.BlockSpec((block_b, inp_dim), lambda i: (i, 0)),      # x tile
                pl.BlockSpec((inp_dim, hid_p), lambda i: (0, 0),
                             pipeline_mode=resident),                    # w1
                pl.BlockSpec((1, hid_p), lambda i: (0, 0),
                             pipeline_mode=resident),                    # b1
                pl.BlockSpec((hid_p, out_p), lambda i: (0, 0),
                             pipeline_mode=resident),                    # w2
                pl.BlockSpec((1, out_p), lambda i: (0, 0),
                             pipeline_mode=resident),                    # b2
            ],
            out_specs=pl.BlockSpec((block_b, out_p), lambda i: (i, 0)),
            scratch_shapes=[pltpu.VMEM((block_b, hid_p), cdt)],
        ),
        compiler_params=pltpu.CompilerParams(
            dimension_semantics=("parallel",),
            vmem_limit_bytes=vmem_limit),
        cost_estimate=cost,
    )(x_in, w1_p, b1_p, w2_p, b2_p)

    if unpad_output:
        return out_padded[:B, :out_dim]
    # Perf path: rows-only slice (contiguous; no-op when B == B_p), keep the
    # lane-padded columns (padded columns are exactly zero).
    return out_padded if B_p == B else out_padded[:B]


def init_mlp_att_params(key, inp_dim, hid_dim, out_dim, dtype=jnp.float32):
    # Matches nn.init.normal_(W, 0, 0.02) and zero biases (deterministic).
    k1, k2 = jax.random.split(key)
    w1 = (jax.random.normal(k1, (inp_dim, hid_dim)) * 0.02).astype(dtype)
    w2 = (jax.random.normal(k2, (hid_dim, out_dim)) * 0.02).astype(dtype)
    b1 = jnp.zeros((hid_dim,), dtype)
    b2 = jnp.zeros((out_dim,), dtype)
    return w1, b1, w2, b2


def _reference(x, w1, b1, w2, b2, compute_dtype=jnp.float32):
    # Pure-JAX reference using the same cast policy as the kernel (f32 result).
    cd = jnp.dtype(compute_dtype)
    h = jnp.dot(x.astype(cd), w1.astype(cd), preferred_element_type=jnp.float32)
    h = jnp.maximum(h + jnp.reshape(b1, (1, -1)).astype(jnp.float32), 0.0)
    y = jnp.dot(h.astype(cd), w2.astype(cd), preferred_element_type=jnp.float32)
    y = jnp.maximum(y + jnp.reshape(b2, (1, -1)).astype(jnp.float32), 0.0)
    return y


if __name__ == "__main__":
    key = jax.random.PRNGKey(0)

    # ---- small demo shapes consistent with MLP_att ----
    B, inp_dim, hid_dim, out_dim = 8, 32, 16, 24
    kx, kp = jax.random.split(key)
    x = jax.random.normal(kx, (B, inp_dim), jnp.float32)
    w1, b1, w2, b2 = init_mlp_att_params(kp, inp_dim, hid_dim, out_dim)

    # Weight padding + bf16 cast happens ONCE here (hoisted out of forward).
    params = prepare_mlp_att_params(w1, b1, w2, b2)      # bf16 compute (default)
    out = mlp_att_forward(x, params)                     # bf16 output by default
    jax.block_until_ready(out)
    assert out.shape == (B, out_dim)
    assert out.dtype == jnp.bfloat16

    # Reference with the same bf16 cast policy (tight tolerance)...
    ref_bf16 = _reference(x, w1, b1, w2, b2, compute_dtype=jnp.bfloat16)
    assert jnp.allclose(out.astype(jnp.float32), ref_bf16, atol=2e-3, rtol=2e-2)
    # ...and the pure f32 PyTorch-equivalent reference (bf16-rounding tolerance).
    ref_f32 = _reference(x, w1, b1, w2, b2, compute_dtype=jnp.float32)
    assert jnp.allclose(out.astype(jnp.float32), ref_f32, atol=5e-3, rtol=5e-2)

    # ---- exact-precision path (f32 compute + f32 output, matches torch f32) ----
    params_f32 = prepare_mlp_att_params(w1, b1, w2, b2,
                                        compute_dtype=jnp.float32)
    out_f32 = mlp_att_forward(x, params_f32, out_dtype=jnp.float32)
    jax.block_until_ready(out_f32)
    assert out_f32.shape == (B, out_dim) and out_f32.dtype == jnp.float32
    assert jnp.allclose(out_f32, ref_f32, atol=2e-3, rtol=1e-2)

    # ---- larger config: grid > 1 exercises pipelining / both v7x TCs ----
    B2, inp2, hid2, out2 = 1024, 256, 256, 85     # 85 = AwA attribute count
    kx2, kp2 = jax.random.split(jax.random.PRNGKey(1))
    x2 = jax.random.normal(kx2, (B2, inp2), jnp.float32)
    p2 = init_mlp_att_params(kp2, inp2, hid2, out2)
    params2 = prepare_mlp_att_params(*p2)
    # Perf path: keep the lane-padded output slab (no column-slice copy).
    out2_pad = mlp_att_forward(x2, params2, block_b=512, unpad_output=False)
    jax.block_until_ready(out2_pad)
    assert out2_pad.shape == (B2, 128)
    ref2 = _reference(x2, *p2, compute_dtype=jnp.bfloat16)
    assert jnp.allclose(out2_pad[:, :out2].astype(jnp.float32), ref2,
                        atol=5e-3, rtol=2e-2)
    # Padded attribute columns are exactly zero (ReLU(0 + 0)).
    assert bool(jnp.all(out2_pad[:, out2:] == 0))

    print("KERNEL_OK")
</pallas_src>

<mosaic_0001>
module attributes {stable_mosaic.version = 11 : i64} {
  func.func @_mlp_att_kernel(%arg0: i32, %arg1: memref<16x32xf32, #tpu.memory_space<vmem>>, %arg2: memref<32x128xbf16, #tpu.memory_space<vmem>>, %arg3: memref<1x128xf32, #tpu.memory_space<vmem>>, %arg4: memref<128x128xbf16, #tpu.memory_space<vmem>>, %arg5: memref<1x128xf32, #tpu.memory_space<vmem>>, %arg6: memref<16x128xbf16, #tpu.memory_space<vmem>>, %arg7: memref<16x128xbf16, #tpu.memory_space<vmem>>) attributes {dimension_semantics = [#tpu.dimension_semantics<parallel>], iteration_bounds = array<i64: 1>, scalar_prefetch = 0 : i64, scratch_operands = 1 : i64, tpu.core_type = #tpu.core_type<tc>, window_params = [{transform_indices = @transform_0, window_bounds = array<i64: 16, 32>}, {pipeline_mode = #tpu.pipeline_mode<synchronous>, transform_indices = @transform_1, window_bounds = array<i64: 32, 128>}, {pipeline_mode = #tpu.pipeline_mode<synchronous>, transform_indices = @transform_2, window_bounds = array<i64: 1, 128>}, {pipeline_mode = #tpu.pipeline_mode<synchronous>, transform_indices = @transform_3, window_bounds = array<i64: 128, 128>}, {pipeline_mode = #tpu.pipeline_mode<synchronous>, transform_indices = @transform_4, window_bounds = array<i64: 1, 128>}, {transform_indices = @transform_5, window_bounds = array<i64: 16, 128>}]} {
    %c0 = arith.constant 0 : index
    %c0_0 = arith.constant 0 : index
    %0 = vector.load %arg1[%c0, %c0_0] : memref<16x32xf32, #tpu.memory_space<vmem>>, vector<16x32xf32>
    %1 = arith.truncf %0 : vector<16x32xf32> to vector<16x32xbf16>
    %c0_1 = arith.constant 0 : index
    %c0_2 = arith.constant 0 : index
    %2 = vector.load %arg2[%c0_1, %c0_2] : memref<32x128xbf16, #tpu.memory_space<vmem>>, vector<32x128xbf16>
    %cst = arith.constant dense<0.000000e+00> : vector<16x128xf32>
    %3 = tpu.matmul %1, %2, %cst {dimension_numbers = #tpu.dot_dimension_numbers<[1], [0], [0], [1], [0, 0, 1, 1], [], []>} : vector<16x32xbf16>, vector<32x128xbf16>, vector<16x128xf32> -> vector<16x128xf32>
    %c0_3 = arith.constant 0 : index
    %c0_4 = arith.constant 0 : index
    %4 = vector.load %arg3[%c0_3, %c0_4] : memref<1x128xf32, #tpu.memory_space<vmem>>, vector<1x128xf32>
    %5 = vector.broadcast %4 : vector<1x128xf32> to vector<16x128xf32>
    %6 = arith.addf %3, %5 : vector<16x128xf32>
    %cst_5 = arith.constant 0.000000e+00 : f32
    %7 = vector.broadcast %cst_5 : f32 to vector<16x128xf32>
    %8 = arith.maximumf %6, %7 : vector<16x128xf32>
    %9 = arith.truncf %8 : vector<16x128xf32> to vector<16x128xbf16>
    %c0_6 = arith.constant 0 : index
    %c0_7 = arith.constant 0 : index
    %10 = vector.load %arg7[%c0_6, %c0_7] : memref<16x128xbf16, #tpu.memory_space<vmem>>, vector<16x128xbf16>
    tpu.vector_store %arg7[%c0_6, %c0_7], %9 {strides = array<i32>} : memref<16x128xbf16, #tpu.memory_space<vmem>>, vector<16x128xbf16>,
    %c0_8 = arith.constant 0 : index
    %c0_9 = arith.constant 0 : index
    %11 = vector.load %arg7[%c0_8, %c0_9] : memref<16x128xbf16, #tpu.memory_space<vmem>>, vector<16x128xbf16>
    %c0_10 = arith.constant 0 : index
    %c0_11 = arith.constant 0 : index
    %12 = vector.load %arg4[%c0_10, %c0_11] : memref<128x128xbf16, #tpu.memory_space<vmem>>, vector<128x128xbf16>
    %cst_12 = arith.constant dense<0.000000e+00> : vector<16x128xf32>
    %13 = tpu.matmul %11, %12, %cst_12 {dimension_numbers = #tpu.dot_dimension_numbers<[1], [0], [0], [1], [0, 0, 1, 1], [], []>} : vector<16x128xbf16>, vector<128x128xbf16>, vector<16x128xf32> -> vector<16x128xf32>
    %c0_13 = arith.constant 0 : index
    %c0_14 = arith.constant 0 : index
    %14 = vector.load %arg5[%c0_13, %c0_14] : memref<1x128xf32, #tpu.memory_space<vmem>>, vector<1x128xf32>
    %15 = vector.broadcast %14 : vector<1x128xf32> to vector<16x128xf32>
    %16 = arith.addf %13, %15 : vector<16x128xf32>
    %cst_15 = arith.constant 0.000000e+00 : f32
    %17 = vector.broadcast %cst_15 : f32 to vector<16x128xf32>
    %18 = arith.maximumf %16, %17 : vector<16x128xf32>
    %19 = arith.truncf %18 : vector<16x128xf32> to vector<16x128xbf16>
    %c0_16 = arith.constant 0 : index
    %c0_17 = arith.constant 0 : index
    %20 = vector.load %arg6[%c0_16, %c0_17] : memref<16x128xbf16, #tpu.memory_space<vmem>>, vector<16x128xbf16>
    tpu.vector_store %arg6[%c0_16, %c0_17], %19 {strides = array<i32>} : memref<16x128xbf16, #tpu.memory_space<vmem>>, vector<16x128xbf16>,
    return
  }
  func.func @transform_0(%arg0: i32) -> (i32, i32) {
    %c0_i32 = arith.constant 0 : i32
    %c0_i32_0 = arith.constant 0 : i32
    return %arg0, %c0_i32 : i32, i32
  }
  func.func @transform_1(%arg0: i32) -> (i32, i32) {
    %c0_i32 = arith.constant 0 : i32
    %c0_i32_0 = arith.constant 0 : i32
    %c0_i32_1 = arith.constant 0 : i32
    return %c0_i32, %c0_i32_0 : i32, i32
  }
  func.func @transform_2(%arg0: i32) -> (i32, i32) {
    %c0_i32 = arith.constant 0 : i32
    %c0_i32_0 = arith.constant 0 : i32
    %c0_i32_1 = arith.constant 0 : i32
    return %c0_i32, %c0_i32_0 : i32, i32
  }
  func.func @transform_3(%arg0: i32) -> (i32, i32) {
    %c0_i32 = arith.constant 0 : i32
    %c0_i32_0 = arith.constant 0 : i32
    %c0_i32_1 = arith.constant 0 : i32
    return %c0_i32, %c0_i32_0 : i32, i32
  }
  func.func @transform_4(%arg0: i32) -> (i32, i32) {
    %c0_i32 = arith.constant 0 : i32
    %c0_i32_0 = arith.constant 0 : i32
    %c0_i32_1 = arith.constant 0 : i32
    return %c0_i32, %c0_i32_0 : i32, i32
  }
  func.func @transform_5(%arg0: i32) -> (i32, i32) {
    %c0_i32 = arith.constant 0 : i32
    %c0_i32_0 = arith.constant 0 : i32
    return %arg0, %c0_i32 : i32, i32
  }
}

</mosaic_0001>

<bundles_post_ra>
// kernel: tpu_custom_call.1
= control target key start
LH: loop header
LB: loop body
LE: loop exit
PB: predicated region body
PF: predicated region fallthrough
CT: control target
= control target key end

     0   :  { %10 = vsyncpa [#allocation4], 0  ;;  %s560_s0 = inlined_call_operand.hbm [shape: f32[16,32], index: 0, kind: input, shape index: {}]   ;;  %s561_s1 = inlined_call_operand.hbm [shape: bf16[32,128], index: 1, kind: input, shape index: {}]   ;;  %s562_s2 = inlined_call_operand.vmem [shape: f32[1,128], index: 2, kind: input, shape index: {}]   ;;  %s563_s3 = inlined_call_operand.hbm [shape: bf16[128,128], index: 3, kind: input, shape index: {}]   ;;  %s564_s4 = inlined_call_operand.vmem [shape: f32[1,128], index: 4, kind: input, shape index: {}]   ;;  %s565_s5 = inlined_call_operand.hbm [shape: bf16[16,128], index: 5, kind: output, shape index: {}]  }
   0x1   :  { %11 = vsyncpa [#allocation7], 0 }
   0x2   :  { %12 = vsyncpa [#allocation5], 0  ;;  %s457_s18 = smov [#allocation6]   ;;  %s363_s22 = scalar_lea.hbm %s561_s1, 256 }
   0x3   :  { %s30_s19 = sshll.u32 %s457_s18, 4  ;;  %p364_p0 = scmp.ne.s32.totalorder %s561_s1, %s363_s22  ;;  %s31_s19 = int_to_ptr.vmem [resolvable:$true] %s30_s19 }
   0x4   :  { %p367_p1 = scmp.lt.u32.totalorder %s363_s22, %s561_s1 }
   0x6   :  { %p369_p2 = pnand %p367_p1, %p364_p0 }
   0x8   :  { %372 = shalt.err (!%p369_p2)
}
   0x9   :  { %s373_s27 = scalar_lea.vmem %s31_s19, 256  ;;  %p378_p4 = scmp.lt.s32.totalorder %s31_s19, %s31_s19 }
   0xa   :  { %p374_p3 = scmp.ne.s32.totalorder %s31_s19, %s373_s27  ;;  %p379_p5 = scmp.lt.s32.totalorder %s373_s27, %s373_s27 }
   0xc   :  { %p380_p6 = por %p379_p5, %p378_p4 }
   0xe   :  { %p381_p7 = pnand %p380_p6, %p374_p3 }
  0x10   :  { %384 = shalt.err (!%p381_p7)
}
  0x11   :  { %s458_s28 = smov 64   ;;  %s459_s29 = smov 4  }
  0x12   :  { %36 = dma.hbm_to_vmem [thread:$0]  %s561_s1, 256, %s31_s19, [#allocation7], %s458_s28, %s458_s28, %s459_s29  }
  0x13   :  { %s460_s7 = smov [#allocation3]   ;;  %s385_s11 = scalar_lea.hbm %s560_s0, 256 }
  0x14   :  { %s18_s8 = sshll.u32 %s460_s7, 4  ;;  %p386_p8 = scmp.ne.s32.totalorder %s560_s0, %s385_s11  ;;  %s19_s8 = int_to_ptr.vmem [resolvable:$true] %s18_s8 }
  0x15   :  { %p389_p9 = scmp.lt.u32.totalorder %s385_s11, %s560_s0 }
  0x17   :  { %p391_p10 = pnand %p389_p9, %p386_p8 }
  0x19   :  { %394 = shalt.err (!%p391_p10)
}
  0x1a   :  { %s395_s16 = scalar_lea.vmem %s19_s8, 256  ;;  %p400_p12 = scmp.lt.s32.totalorder %s19_s8, %s19_s8 }
  0x1b   :  { %p396_p11 = scmp.ne.s32.totalorder %s19_s8, %s395_s16  ;;  %p401_p13 = scmp.lt.s32.totalorder %s395_s16, %s395_s16 }
  0x1d   :  { %p402_p0 = por %p401_p13, %p400_p12 }
  0x1f   :  { %p403_p1 = pnand %p402_p0, %p396_p11 }
  0x21   :  { %406 = shalt.err (!%p403_p1)
}
  0x22   :  { %s461_s1 = smov 128   ;;  %s462_s17 = smov 8  }
  0x23   :  { %24 = dma.hbm_to_vmem [thread:$0]  %s560_s0, 256, %s19_s8, [#allocation4], %s461_s1, %s461_s1, %s462_s17  }
  0x24   :  { %s463_s20 = smov [#allocation8]   ;;  %s407_s24 = scalar_lea.hbm %s563_s3, 1024 }
  0x25   :  { %s44_s21 = sshll.u32 %s463_s20, 4  ;;  %p408_p2 = scmp.ne.s32.totalorder %s563_s3, %s407_s24  ;;  %s45_s21 = int_to_ptr.vmem [resolvable:$true] %s44_s21 }
  0x26   :  { %p411_p3 = scmp.lt.u32.totalorder %s407_s24, %s563_s3 }
  0x28   :  { %p413_p4 = pnand %p411_p3, %p408_p2 }
  0x2a   :  { %416 = shalt.err (!%p413_p4)
}
  0x2b   :  { %s417_s6 = scalar_lea.vmem %s45_s21, 1024  ;;  %p422_p6 = scmp.lt.s32.totalorder %s45_s21, %s45_s21 }
  0x2c   :  { %p418_p5 = scmp.ne.s32.totalorder %s45_s21, %s417_s6  ;;  %p423_p7 = scmp.lt.s32.totalorder %s417_s6, %s417_s6 }
  0x2e   :  { %p424_p8 = por %p423_p7, %p422_p6 }
  0x30   :  { %p425_p9 = pnand %p424_p8, %p418_p5 }
  0x32   :  { %428 = shalt.err (!%p425_p9)
}
  0x33   :  { %50 = dma.hbm_to_vmem [thread:$0]  %s563_s3, 1024, %s45_s21, [#allocation7], %s458_s28, %s458_s28, %s459_s29  }
  0x34   :  { %451 = dma.done.wait [#allocation4], 256  }
  0x35   :  { %452 = vsyncadd [#allocation4], 4294967040 }
  0x36   :  { %453 = dma.done.wait [#allocation7], 1280  }
  0x37   :  { %454 = vsyncadd [#allocation7], 4294966016  ;;  %v464_v0 = vmov 0.0   ;;  %vm465_vm0 = vmmov 0   ;;  %v353_v1 = vld [vmem:[#allocation6] sm:$0xff]   ;;  %v354_v2 = vld [vmem:[#allocation6 + $0x8] sm:$0xff]  }
  0x38   :  { %315 = vmatprep.subr.bf16.mxu0 %v464_v0  ;;  %319 = vmatprep.mubr.msk.bf16.mxu0 %vm465_vm0, %v464_v0  ;;  %v63_v3 = vld [vmem:[#allocation3] sm:$0xff]  ;;  %v64_v4 = vld [vmem:[#allocation3 + $0x8] sm:$0xff]  ;;  %vm89_vm1 = vcmask 261120   ;;  %v357_v8 = vld [vmem:[#allocation8 + $0x10] sm:$0xff]  }
  0x39   :  { %323 = vmatprep.subr.bf16.mxu1 %v464_v0  ;;  %339 = vmatprep.mubr.msk.bf16.mxu1 %vm465_vm0, %v464_v0  ;;  %v355_v5 = vld [vmem:[#allocation8] sm:$0xff]   ;;  %v65_v6 = vpack.c.bf16 %v64_v4, %v63_v3  ;;  %v356_v7 = vld [vmem:[#allocation8 + $0x8] sm:$0xff]   ;;  %v358_v9 = vld [vmem:[#allocation8 + $0x18] sm:$0xff]  }
  0x3a   :  { %316 = vmatpush3.bf16.msra.mxu0 %v353_v1  ;;  %324 = vmatpush3.bf16.msra.mxu1 %v355_v5  ;;  %v359_v10 = vld [vmem:[#allocation8 + $0x20] sm:$0xff]   ;;  %v360_v11 = vld [vmem:[#allocation8 + $0x28] sm:$0xff]   ;;  %v361_v12 = vld [vmem:[#allocation8 + $0x30] sm:$0xff]  }
  0x3b   :  { %317 = vmatprep.subr.bf16.mxu0 %v464_v0  ;;  %325 = vmatprep.subr.bf16.mxu1 %v464_v0  ;;  %v362_v13 = vld [vmem:[#allocation8 + $0x38] sm:$0xff]   ;;  %v281_v14 = vld [vmem:[%s562_s2] ss:$0 sm:$0xff]  ;;  %s466_s2 = smov [#allocation9]  }
  0x3c   :  { %v285_v24 = vld [vmem:[%s564_s4] ss:$0 sm:$0xff]  ;;  %s268_s11 = sshll.u32 %s466_s2, 4  ;;  %s269_s11 = int_to_ptr.vmem [resolvable:$true] %s268_s11 }
  0x3d   :  { %s429_s12 = scalar_lea.vmem %s269_s11, 128  ;;  %p434_p11 = scmp.lt.s32.totalorder %s269_s11, %s269_s11 }
  0x3e   :  { %318 = vmatpush3.bf16.msra.mxu0 %v354_v2  ;;  %326 = vmatpush3.bf16.msra.mxu1 %v356_v7  ;;  %p430_p10 = scmp.ne.s32.totalorder %s269_s11, %s429_s12  ;;  %p435_p12 = scmp.lt.s32.totalorder %s429_s12, %s429_s12 }
  0x3f   :  { %327 = vmatprep.subr.bf16.mxu1 %v464_v0 }
  0x40   :  { %p436_p13 = por %p435_p12, %p434_p11 }
  0x41   :  { %320 = vmatmul.mubr.msk.bf16.vlgmr.msra.gmra.mrb[0].mxu0 %vm89_vm1, %v65_v6 }
  0x42   :  { %328 = vmatpush3.bf16.msra.mxu1 %v357_v8  ;;  %p437_p0 = pnand %p436_p13, %p430_p10 }
  0x43   :  { %329 = vmatprep.subr.bf16.mxu1 %v464_v0 }
  0x46   :  { %330 = vmatpush3.bf16.msra.mxu1 %v358_v9 }
  0x47   :  { %331 = vmatprep.subr.bf16.mxu1 %v464_v0 }
  0x4a   :  { %332 = vmatpush3.bf16.msra.mxu1 %v359_v10 }
  0x4b   :  { %333 = vmatprep.subr.bf16.mxu1 %v464_v0 }
  0x4e   :  { %334 = vmatpush3.bf16.msra.mxu1 %v360_v11 }
  0x4f   :  { %335 = vmatprep.subr.bf16.mxu1 %v464_v0 }
  0x52   :  { %336 = vmatpush3.bf16.msra.mxu1 %v361_v12 }
  0x53   :  { %337 = vmatprep.subr.bf16.mxu1 %v464_v0 }
  0x56   :  { %338 = vmatpush3.bf16.msra.mxu1 %v362_v13 }
 0x114   :  { %v127_v15 = vpop.f32.mrb[0].mxu0 }
 0x115   :  { %v128_v16 = vadd.f32 %v281_v14, %v127_v15  ;;  %v321_v17 = vpop.f32.mrb[1].mxu0 }
 0x116   :  { %v130_v18 = vpop.f32.mrb[2].mxu0 }
 0x117   :  { %v131_v19 = vadd.f32 %v281_v14, %v130_v18  ;;  %v322_v20 = vpop.f32.mrb[3].mxu0  ;;  %v134_v21 = vmax.f32 %v128_v16, 0.0 }
 0x119   :  { %v135_v22 = vmax.f32 %v131_v19, 0.0 }
 0x11b   :  { %v136_v23 = vpack.c.bf16 %v135_v22, %v134_v21 }
 0x11d   :  { %340 = vmatmul.mubr.bf16.vlgmr.msra.gmra.mrb[0].mxu1 %v136_v23 }
 0x1f0   :  { %v244_v25 = vpop.f32.mrb[0].mxu1 }
 0x1f1   :  { %v245_v26 = vadd.f32 %v285_v24, %v244_v25  ;;  %v341_v27 = vpop.f32.mrb[1].mxu1 }
 0x1f2   :  { %v247_v28 = vpop.f32.mrb[2].mxu1 }
 0x1f3   :  { %v248_v29 = vadd.f32 %v285_v24, %v247_v28  ;;  %v342_v30 = vpop.f32.mrb[3].mxu1  ;;  %v251_v31 = vmax.f32 %v245_v26, 0.0 }
 0x1f5   :  { %v252_v32 = vmax.f32 %v248_v29, 0.0 }
 0x1f7   :  { %v301_v33 = vpack.c.bf16 %v252_v32, %v251_v31 }
 0x1f9   :  { %302 = vst [vmem:[#allocation9] sm:$0xff] %v301_v33  }
 0x1fa   :  { %440 = shalt.err (!%p437_p0)
}
 0x1fb   :  { %s441_s14 = scalar_lea.hbm %s565_s5, 128 }
 0x1fc   :  { %p442_p1 = scmp.ne.s32.totalorder %s565_s5, %s441_s14  ;;  %p445_p2 = scmp.lt.u32.totalorder %s441_s14, %s565_s5 }
 0x1fe   :  { %p447_p3 = pnand %p445_p2, %p442_p1 }
 0x200   :  { %450 = shalt.err (!%p447_p3)
}
 0x201   :  { %274 = dma.vmem_to_hbm [thread:$0]  %s269_s11, 128, %s565_s5, [#allocation5], %s458_s28, %s458_s28, %s459_s29  }
 0x202   :  { %455 = dma.done.wait [#allocation5], 128  }
 0x203   :  { %456 = vsyncadd [#allocation5], 4294967168 }
 0x204   :  { %278 = vsyncpa [#allocation4], 1 }
 0x205   :  { %279 = vsyncpa [#allocation7], 1 }
 0x206   :  { %280 = vsyncpa [#allocation5], 1 }

</bundles_post_ra>
